<compile_context>
chip_gen: v6e
topology: v6e:2x2x1
jax: 0.10.0
libtpu: 0.0.40
codegen_flags: <defaults>
</compile_context>

<pallas_src>
import functools
import numpy as np

import jax
import jax.numpy as jnp
from jax.experimental import pallas as pl
from jax.experimental.pallas import tpu as pltpu

NCLASSES = 20
BN_EPS = 1e-5

_DTYPES = {"float32": jnp.float32, "bfloat16": jnp.bfloat16}


# ----------------------------------------------------------------------------
# small helpers
# ----------------------------------------------------------------------------
def _round_up(x, m):
    return (x + m - 1) // m * m


def _pick_tm(M):
    # bf16 A tiles: keep the sublane (second-minor) dim a multiple of 16.
    Mp = _round_up(M, 16)
    if Mp <= 256:
        return Mp, Mp
    for tm in (256, 128, 64, 32, 16):
        if Mp % tm == 0:
            return Mp, tm
    return Mp, 16


def _pick_tk(K):
    Kp = _round_up(K, 128)
    if Kp <= 512:
        return Kp, Kp
    for tk in (512, 256, 128):
        if Kp % tk == 0:
            return Kp, tk
    return Kp, 128  # unreachable (Kp is a multiple of 128)


def _pick_tn(N):
    # 256-wide N tiles feed the full 256-wide MXU on v6e/v7x.
    if N % 128 == 0:
        if N % 256 == 0:
            return N, 256
        return N, 128
    if N > 128:
        Np = _round_up(N, 128)
        return Np, 128
    # small N (64 stem channels, 20-class fc): block == full dim, no padding
    return N, N


# ----------------------------------------------------------------------------
# Pallas kernel 1: tiled bf16 GEMM, f32 accumulation, fused scale/bias epilogue
#   out = maybe_relu((A @ B) * scale + bias [+ residual])
# ----------------------------------------------------------------------------
@functools.lru_cache(maxsize=None)
def _build_fused_matmul(Mp, Kp, Np, tm, tk, tn, relu, with_res, out_dtype):
    odt = _DTYPES[out_dtype]

    def kernel(*refs):
        if with_res:
            a_ref, b_ref, s_ref, c_ref, r_ref, o_ref, acc_ref = refs
        else:
            a_ref, b_ref, s_ref, c_ref, o_ref, acc_ref = refs
            r_ref = None

        @pl.when(pl.program_id(2) == 0)
        def _():
            acc_ref[...] = jnp.zeros_like(acc_ref)

        acc_ref[...] += jnp.dot(a_ref[...], b_ref[...],
                                preferred_element_type=jnp.float32)

        @pl.when(pl.program_id(2) == pl.num_programs(2) - 1)
        def _():
            y = acc_ref[...] * s_ref[...] + c_ref[...]
            if with_res:
                y = y + r_ref[...].astype(jnp.float32)
            if relu:
                y = jnp.maximum(y, 0.0)
            o_ref[...] = y.astype(o_ref.dtype)

    in_specs = [
        pl.BlockSpec((tm, tk), lambda i, j, k: (i, k)),
        pl.BlockSpec((tk, tn), lambda i, j, k: (k, j)),
        pl.BlockSpec((1, tn), lambda i, j, k: (0, j)),
        pl.BlockSpec((1, tn), lambda i, j, k: (0, j)),
    ]
    if with_res:
        in_specs.append(pl.BlockSpec((tm, tn), lambda i, j, k: (i, j)))

    grid = (Mp // tm, Np // tn, Kp // tk)
    return pl.pallas_call(
        kernel,
        out_shape=jax.ShapeDtypeStruct((Mp, Np), odt),
        grid_spec=pltpu.PrefetchScalarGridSpec(
            num_scalar_prefetch=0,
            grid=grid,
            in_specs=in_specs,
            out_specs=pl.BlockSpec((tm, tn), lambda i, j, k: (i, j)),
            scratch_shapes=[pltpu.VMEM((tm, tn), jnp.float32)],
        ),
        compiler_params=pltpu.CompilerParams(
            dimension_semantics=("parallel", "parallel", "arbitrary")),
    )


@functools.partial(jax.jit, static_argnames=("relu", "out_dtype"))
def fused_matmul(a, b, scale, bias, residual=None, *, relu, out_dtype="float32"):
    """a: (M, K), b: (K, N) bf16 weights, scale/bias: (1, N) or (N,) f32."""
    M, K = a.shape
    K2, N = b.shape
    assert K == K2
    Mp, tm = _pick_tm(M)
    Kp, tk = _pick_tk(K)
    Np, tn = _pick_tn(N)

    a_p = a.astype(jnp.bfloat16)
    if (Mp - M) or (Kp - K):
        a_p = jnp.pad(a_p, ((0, Mp - M), (0, Kp - K)))
    b_p = b.astype(jnp.bfloat16)
    if (Kp - K) or (Np - N):
        b_p = jnp.pad(b_p, ((0, Kp - K), (0, Np - N)))
    s_p = scale.reshape(1, -1).astype(jnp.float32)
    c_p = bias.reshape(1, -1).astype(jnp.float32)
    if Np - N:
        s_p = jnp.pad(s_p, ((0, 0), (0, Np - N)))
        c_p = jnp.pad(c_p, ((0, 0), (0, Np - N)))

    args = [a_p, b_p, s_p, c_p]
    if residual is not None:
        r_p = residual.astype(jnp.bfloat16)   # bf16 residual: half the HBM read
        if (Mp - M) or (Np - N):
            r_p = jnp.pad(r_p, ((0, Mp - M), (0, Np - N)))
        args.append(r_p)

    fn = _build_fused_matmul(Mp, Kp, Np, tm, tk, tn,
                             bool(relu), residual is not None, out_dtype)
    out = fn(*args)
    if (Mp - M) or (Np - N):
        out = out[:M, :N]
    return out


# ----------------------------------------------------------------------------
# Pallas kernel 2: direct (im2col-free) 3x3 / stride-1 / pad-1 conv + BN + ReLU
#
# The padded NHWC image is passed flattened to (Hp*Wp, C) (free reshape in
# HBM). For output row pitch Wp, tap (dy, dx) is a constant row shift of
# dy*Wp + dx in the flat slab, so the conv is 9 shifted (Ho*Wp, C) x (C, tn)
# MXU matmuls accumulated in f32. Columns w >= Wo of each output row are
# garbage and sliced off outside. Extra bottom pad rows keep all shifted
# slices in bounds (they only ever feed the discarded columns).
# ----------------------------------------------------------------------------
@functools.lru_cache(maxsize=None)
def _build_conv3x3_s1(N, C, Cout, H, W, tn, relu, out_dtype):
    odt = _DTYPES[out_dtype]
    Wp = W + 2
    HpWp = (H + 3) * Wp
    HoWp = H * Wp
    tap_offsets = tuple(dy * Wp + dx for dy in range(3) for dx in range(3))

    def kernel(x_ref, w_ref, s_ref, c_ref, o_ref):
        # load the whole padded slab once; do the (cheap) unaligned row slices
        # in f32 (robust sublane shifts), cast back to bf16 for the MXU.
        xa = x_ref[0].astype(jnp.float32)                 # (HpWp, C)
        acc = jnp.zeros((HoWp, tn), jnp.float32)
        for t, off in enumerate(tap_offsets):             # static unroll, 9 taps
            a = xa[off:off + HoWp, :].astype(jnp.bfloat16)
            acc = acc + jnp.dot(a, w_ref[t],
                                preferred_element_type=jnp.float32)
        y = acc * s_ref[...] + c_ref[...]
        if relu:
            y = jnp.maximum(y, 0.0)
        o_ref[0] = y.astype(o_ref.dtype)

    grid = (N, Cout // tn)
    return pl.pallas_call(
        kernel,
        out_shape=jax.ShapeDtypeStruct((N, HoWp, Cout), odt),
        grid_spec=pltpu.PrefetchScalarGridSpec(
            num_scalar_prefetch=0,
            grid=grid,
            in_specs=[
                pl.BlockSpec((1, HpWp, C), lambda n, j: (n, 0, 0)),
                pl.BlockSpec((9, C, tn), lambda n, j: (0, 0, j)),
                pl.BlockSpec((1, tn), lambda n, j: (0, j)),
                pl.BlockSpec((1, tn), lambda n, j: (0, j)),
            ],
            out_specs=pl.BlockSpec((1, HoWp, tn), lambda n, j: (n, 0, j)),
        ),
        compiler_params=pltpu.CompilerParams(
            dimension_semantics=("parallel", "parallel")),
    )


@functools.partial(jax.jit, static_argnames=("relu", "out_dtype"))
def conv3x3_s1_bn_act(x, w, scale, bias, *, relu, out_dtype="bfloat16"):
    """x: (N, H, W, C), w: (9*C, Cout) bf16 -> (N, H, W, Cout)."""
    n, h, wd, c = x.shape
    cout = w.shape[-1]
    # pad: top 1 / bottom 2 / left 1 / right 1 (bottom extra row only feeds the
    # discarded garbage columns; it keeps the flat shifted slices in bounds).
    xp = jnp.pad(x.astype(jnp.bfloat16), ((0, 0), (1, 2), (1, 1), (0, 0)))
    wp = wd + 2
    x_flat = xp.reshape(n, (h + 3) * wp, c)               # free HBM reshape
    w_taps = w.reshape(9, c, cout)
    if cout % 256 == 0:
        tn = 256
    elif cout % 128 == 0:
        tn = 128
    else:
        tn = cout
    fn = _build_conv3x3_s1(n, c, cout, h, wd, tn, bool(relu), out_dtype)
    out = fn(x_flat, w_taps, scale, bias)
    # drop the garbage columns (row pitch Wp -> valid width W)
    return out.reshape(n, h, wp, cout)[:, :, :wd, :]
    # TODO(synk): tile the spatial (HoWp) dim for very large resolutions where
    # a whole per-image slab would not fit VMEM (not needed for ResNet @ <=256).


# ----------------------------------------------------------------------------
# maxpool 3x3 / s2 / p1 — running max over the 9 strided taps (fused by XLA;
# no 9x stacked tensor).
# ----------------------------------------------------------------------------
@jax.jit
def maxpool_3x3_s2_p1(x):
    n, h, w, c = x.shape
    xp = jnp.pad(x, ((0, 0), (1, 1), (1, 1), (0, 0)), constant_values=-np.inf)
    ho = (h + 2 - 3) // 2 + 1
    wo = (w + 2 - 3) // 2 + 1
    out = None
    for dy in range(3):
        for dx in range(3):
            tap = xp[:, dy:dy + 2 * ho:2, dx:dx + 2 * wo:2, :]
            out = tap if out is None else jnp.maximum(out, tap)
    return out


# ----------------------------------------------------------------------------
# im2col fallback (only for the 7x7/s2 stem conv and the three 3x3/s2 convs)
# ----------------------------------------------------------------------------
def _im2col(x, kh, kw, stride, pad):
    n, h, w, c = x.shape
    if pad:
        x = jnp.pad(x, ((0, 0), (pad, pad), (pad, pad), (0, 0)))
    ho = (h + 2 * pad - kh) // stride + 1
    wo = (w + 2 * pad - kw) // stride + 1
    cols = []
    for dy in range(kh):
        for dx in range(kw):
            cols.append(x[:, dy:dy + stride * ho:stride,
                          dx:dx + stride * wo:stride, :])
    cols = jnp.concatenate(cols, axis=-1)  # (N, Ho, Wo, kh*kw*C), bf16
    return cols, ho, wo


def conv_bn_act(x, cp, relu, residual=None, out_dtype="bfloat16"):
    """conv (no bias) + eval-mode BatchNorm affine + optional ReLU/residual."""
    n = x.shape[0]
    kh, kw, stride, pad = cp["kh"], cp["kw"], cp["stride"], cp["pad"]
    cout = cp["w"].shape[-1]

    if kh == 1 and kw == 1:
        xs = x[:, ::stride, ::stride, :] if stride > 1 else x
        _, ho, wo, cin = xs.shape
        a = xs.reshape(n * ho * wo, cin)
        r = residual.reshape(n * ho * wo, cout) if residual is not None else None
        out = fused_matmul(a, cp["w"], cp["scale"], cp["bias"], r,
                           relu=relu, out_dtype=out_dtype)
        return out.reshape(n, ho, wo, cout)

    if kh == 3 and kw == 3 and stride == 1 and pad == 1 and residual is None:
        return conv3x3_s1_bn_act(x, cp["w"], cp["scale"], cp["bias"],
                                 relu=relu, out_dtype=out_dtype)

    # TODO(synk): the 7x7/s2 stem conv and the 3 strided 3x3 convs still go
    # through im2col (in bf16) + the fused GEMM; a strided direct-conv kernel
    # would remove their remaining 9x/49x activation expansion.
    cols, ho, wo = _im2col(x.astype(jnp.bfloat16), kh, kw, stride, pad)
    a = cols.reshape(n * ho * wo, -1)
    r = residual.reshape(n * ho * wo, cout) if residual is not None else None
    out = fused_matmul(a, cp["w"], cp["scale"], cp["bias"], r,
                       relu=relu, out_dtype=out_dtype)
    return out.reshape(n, ho, wo, cout)


# ----------------------------------------------------------------------------
# deterministic parameter construction (synthetic, not a checkpoint)
# ----------------------------------------------------------------------------
def _make_conv_bn(rng, cin, cout, k, stride, pad, gamma_scale=1.0):
    fan_in = cin * k * k
    w = rng.standard_normal((cout, cin, k, k)).astype(np.float32) * np.sqrt(2.0 / fan_in)
    # (Cout, Cin, kh, kw) -> (kh, kw, Cin, Cout) -> (kh*kw*Cin, Cout); row order
    # (dy, dx, cin) matches both the im2col concat order and the (9, C, Cout)
    # tap reshape used by the direct 3x3 kernel.
    w_mat = np.transpose(w, (2, 3, 1, 0)).reshape(k * k * cin, cout)
    gamma = (1.0 + 0.05 * rng.standard_normal(cout)).astype(np.float32) * gamma_scale
    beta = (0.05 * rng.standard_normal(cout)).astype(np.float32)
    mean = (0.05 * rng.standard_normal(cout)).astype(np.float32)
    var = (1.0 + 0.1 * np.abs(rng.standard_normal(cout))).astype(np.float32)
    scale = gamma / np.sqrt(var + BN_EPS)
    bias = beta - mean * scale
    return {
        "w": jnp.asarray(w_mat, jnp.bfloat16),
        "scale": jnp.asarray(scale.reshape(1, -1), jnp.float32),
        "bias": jnp.asarray(bias.reshape(1, -1), jnp.float32),
        "kh": k, "kw": k, "stride": stride, "pad": pad,
    }


def _make_bottleneck(rng, inplanes, planes, stride, with_downsample):
    p = {
        "conv1": _make_conv_bn(rng, inplanes, planes, 1, 1, 0),
        "conv2": _make_conv_bn(rng, planes, planes, 3, stride, 1),
        # small gamma on the last BN keeps activations bounded through 50 blocks
        "conv3": _make_conv_bn(rng, planes, planes * 4, 1, 1, 0, gamma_scale=0.1),
        "downsample": None,
    }
    if with_downsample:
        p["downsample"] = _make_conv_bn(rng, inplanes, planes * 4, 1, stride, 0)
    return p


def init_resnet152_params(seed=0):
    rng = np.random.RandomState(seed)
    params = {"conv1": _make_conv_bn(rng, 3, 64, 7, 2, 3)}
    inplanes = 64
    stages = []
    # ResNet-152: Bottleneck blocks [3, 8, 36, 3]
    for planes, nblocks, stride in [(64, 3, 1), (128, 8, 2), (256, 36, 2), (512, 3, 2)]:
        blocks = []
        for b in range(nblocks):
            s = stride if b == 0 else 1
            ds = (b == 0) and (s != 1 or inplanes != planes * 4)
            blocks.append(_make_bottleneck(rng, inplanes, planes, s, ds))
            inplanes = planes * 4
        stages.append(blocks)
    params["stages"] = stages
    # replaced fc: Linear(2048 -> 20) with bias
    fcw = (rng.standard_normal((NCLASSES, 2048)).astype(np.float32)
           / np.sqrt(2048.0))
    fcb = (0.01 * rng.standard_normal(NCLASSES)).astype(np.float32)
    params["fc_w"] = jnp.asarray(fcw.T, jnp.bfloat16)                # (2048, 20)
    params["fc_b"] = jnp.asarray(fcb.reshape(1, -1), jnp.float32)
    params["fc_scale"] = jnp.ones((1, NCLASSES), jnp.float32)
    return params


# ----------------------------------------------------------------------------
# forward pass
# ----------------------------------------------------------------------------
def bottleneck_forward(x, p):
    if p["downsample"] is not None:
        identity = conv_bn_act(x, p["downsample"], relu=False)
    else:
        identity = x
    out = conv_bn_act(x, p["conv1"], relu=True)
    out = conv_bn_act(out, p["conv2"], relu=True)
    # residual add + ReLU fused into the conv3 GEMM epilogue
    return conv_bn_act(out, p["conv3"], relu=True, residual=identity)


def net_forward(x_nchw, params):
    """x_nchw: (N, 3, H, W) float32 -> logits (N, 20)."""
    x = jnp.transpose(x_nchw.astype(jnp.float32), (0, 2, 3, 1))  # NCHW -> NHWC
    x = conv_bn_act(x, params["conv1"], relu=True)               # bf16 activations
    x = maxpool_3x3_s2_p1(x)
    for blocks in params["stages"]:
        for bp in blocks:
            x = bottleneck_forward(x, bp)
    # adaptive avg pool to 1x1: reduce in f32 for accuracy -> (N, 2048)
    x = jnp.mean(x.astype(jnp.float32), axis=(1, 2))
    logits = fused_matmul(x, params["fc_w"], params["fc_scale"],
                          params["fc_b"], relu=False, out_dtype="float32")
    return logits


# ----------------------------------------------------------------------------
if __name__ == "__main__":
    params = init_resnet152_params(seed=0)
    key = jax.random.PRNGKey(0)
    # small input consistent with the conv stack (32x32 keeps all stages valid)
    x = jax.random.normal(key, (2, 3, 32, 32), dtype=jnp.float32)
    logits = net_forward(x, params)
    logits = jax.block_until_ready(logits)
    assert logits.shape == (2, NCLASSES), logits.shape
    print("KERNEL_OK")
</pallas_src>

<mosaic_0001>
module attributes {stable_mosaic.version = 11 : i64} {
  func.func @kernel(%arg0: i32, %arg1: i32, %arg2: i32, %arg3: memref<256x256xbf16, #tpu.memory_space<vmem>>, %arg4: memref<256x64xbf16, #tpu.memory_space<vmem>>, %arg5: memref<1x64xf32, #tpu.memory_space<vmem>>, %arg6: memref<1x64xf32, #tpu.memory_space<vmem>>, %arg7: memref<256x64xbf16, #tpu.memory_space<vmem>>, %arg8: memref<256x64xf32, #tpu.memory_space<vmem>>) attributes {dimension_semantics = [#tpu.dimension_semantics<parallel>, #tpu.dimension_semantics<parallel>, #tpu.dimension_semantics<arbitrary>], iteration_bounds = array<i64: 2, 1, 1>, scalar_prefetch = 0 : i64, scratch_operands = 1 : i64, tpu.core_type = #tpu.core_type<tc>, window_params = [{transform_indices = @transform_0, window_bounds = array<i64: 256, 256>}, {transform_indices = @transform_1, window_bounds = array<i64: 256, 64>}, {transform_indices = @transform_2, window_bounds = array<i64: 1, 64>}, {transform_indices = @transform_3, window_bounds = array<i64: 1, 64>}, {transform_indices = @transform_4, window_bounds = array<i64: 256, 64>}]} {
    %c0_i32 = arith.constant 0 : i32
    %0 = arith.cmpi eq, %arg2, %c0_i32 : i32
    %1 = arith.extui %0 : i1 to i32
    %c0_i32_0 = arith.constant 0 : i32
    %2 = arith.cmpi ne, %1, %c0_i32_0 : i32
    scf.if %2 {
      %cst_10 = arith.constant 0.000000e+00 : f32
      %12 = vector.broadcast %cst_10 : f32 to vector<256x64xf32>
      %c0_11 = arith.constant 0 : index
      %c0_12 = arith.constant 0 : index
      %13 = vector.load %arg8[%c0_11, %c0_12] : memref<256x64xf32, #tpu.memory_space<vmem>>, vector<256x64xf32>
      tpu.vector_store %arg8[%c0_11, %c0_12], %12 {strides = array<i32>} : memref<256x64xf32, #tpu.memory_space<vmem>>, vector<256x64xf32>,
    } else {
    }
    %c0 = arith.constant 0 : index
    %c0_1 = arith.constant 0 : index
    %3 = vector.load %arg8[%c0, %c0_1] : memref<256x64xf32, #tpu.memory_space<vmem>>, vector<256x64xf32>
    %c0_2 = arith.constant 0 : index
    %c0_3 = arith.constant 0 : index
    %4 = vector.load %arg3[%c0_2, %c0_3] : memref<256x256xbf16, #tpu.memory_space<vmem>>, vector<256x256xbf16>
    %c0_4 = arith.constant 0 : index
    %c0_5 = arith.constant 0 : index
    %5 = vector.load %arg4[%c0_4, %c0_5] : memref<256x64xbf16, #tpu.memory_space<vmem>>, vector<256x64xbf16>
    %cst = arith.constant dense<0.000000e+00> : vector<256x64xf32>
    %6 = tpu.matmul %4, %5, %cst {dimension_numbers = #tpu.dot_dimension_numbers<[1], [0], [0], [1], [0, 0, 1, 1], [], []>} : vector<256x256xbf16>, vector<256x64xbf16>, vector<256x64xf32> -> vector<256x64xf32>
    %7 = arith.addf %3, %6 : vector<256x64xf32>
    %c0_6 = arith.constant 0 : index
    %c0_7 = arith.constant 0 : index
    %8 = vector.load %arg8[%c0_6, %c0_7] : memref<256x64xf32, #tpu.memory_space<vmem>>, vector<256x64xf32>
    tpu.vector_store %arg8[%c0_6, %c0_7], %7 {strides = array<i32>} : memref<256x64xf32, #tpu.memory_space<vmem>>, vector<256x64xf32>,
    %c0_i32_8 = arith.constant 0 : i32
    %9 = arith.cmpi eq, %arg2, %c0_i32_8 : i32
    %10 = arith.extui %9 : i1 to i32
    %c0_i32_9 = arith.constant 0 : i32
    %11 = arith.cmpi ne, %10, %c0_i32_9 : i32
    scf.if %11 {
      %c0_10 = arith.constant 0 : index
      %c0_11 = arith.constant 0 : index
      %12 = vector.load %arg8[%c0_10, %c0_11] : memref<256x64xf32, #tpu.memory_space<vmem>>, vector<256x64xf32>
      %c0_12 = arith.constant 0 : index
      %c0_13 = arith.constant 0 : index
      %13 = vector.load %arg5[%c0_12, %c0_13] : memref<1x64xf32, #tpu.memory_space<vmem>>, vector<1x64xf32>
      %14 = vector.broadcast %13 : vector<1x64xf32> to vector<256x64xf32>
      %15 = arith.mulf %12, %14 : vector<256x64xf32>
      %c0_14 = arith.constant 0 : index
      %c0_15 = arith.constant 0 : index
      %16 = vector.load %arg6[%c0_14, %c0_15] : memref<1x64xf32, #tpu.memory_space<vmem>>, vector<1x64xf32>
      %17 = vector.broadcast %16 : vector<1x64xf32> to vector<256x64xf32>
      %18 = arith.addf %15, %17 : vector<256x64xf32>
      %cst_16 = arith.constant 0.000000e+00 : f32
      %19 = vector.broadcast %cst_16 : f32 to vector<256x64xf32>
      %20 = arith.maximumf %18, %19 : vector<256x64xf32>
      %21 = arith.truncf %20 : vector<256x64xf32> to vector<256x64xbf16>
      %c0_17 = arith.constant 0 : index
      %c0_18 = arith.constant 0 : index
      %22 = vector.load %arg7[%c0_17, %c0_18] : memref<256x64xbf16, #tpu.memory_space<vmem>>, vector<256x64xbf16>
      tpu.vector_store %arg7[%c0_17, %c0_18], %21 {strides = array<i32>} : memref<256x64xbf16, #tpu.memory_space<vmem>>, vector<256x64xbf16>,
    } else {
    }
    return
  }
  func.func @transform_0(%arg0: i32, %arg1: i32, %arg2: i32) -> (i32, i32) {
    %c0_i32 = arith.constant 0 : i32
    return %arg0, %arg2 : i32, i32
  }
  func.func @transform_1(%arg0: i32, %arg1: i32, %arg2: i32) -> (i32, i32) {
    %c0_i32 = arith.constant 0 : i32
    return %arg2, %arg1 : i32, i32
  }
  func.func @transform_2(%arg0: i32, %arg1: i32, %arg2: i32) -> (i32, i32) {
    %c0_i32 = arith.constant 0 : i32
    %c0_i32_0 = arith.constant 0 : i32
    return %c0_i32, %arg1 : i32, i32
  }
  func.func @transform_3(%arg0: i32, %arg1: i32, %arg2: i32) -> (i32, i32) {
    %c0_i32 = arith.constant 0 : i32
    %c0_i32_0 = arith.constant 0 : i32
    return %c0_i32, %arg1 : i32, i32
  }
  func.func @transform_4(%arg0: i32, %arg1: i32, %arg2: i32) -> (i32, i32) {
    %c0_i32 = arith.constant 0 : i32
    return %arg0, %arg1 : i32, i32
  }
}

</mosaic_0001>

<bundles_post_ra>
// kernel: fused_matmul.1
= control target key start
LH: loop header
LB: loop body
LE: loop exit
PB: predicated region body
PF: predicated region fallthrough
CT: control target
= control target key end

     0   :  { %s1753_s15 = smov 0   ;;  %s1755_s16 = smov 0   ;;  %s2076_s0 = inlined_call_operand.vmem [shape: bf16[512,256], index: 0, kind: input, shape index: {}]   ;;  %s2077_s1 = inlined_call_operand.vmem [shape: bf16[256,64], index: 1, kind: input, shape index: {}]   ;;  %s2078_s2 = inlined_call_operand.vmem [shape: f32[1,64], index: 2, kind: input, shape index: {}]   ;;  %s2079_s3 = inlined_call_operand.vmem [shape: f32[1,64], index: 3, kind: input, shape index: {}]   ;;  %s2080_s4 = inlined_call_operand.vmem [shape: bf16[512,64], index: 4, kind: output, shape index: {}]  }
   0x1   :  { %s1757_s17 = smov 0  }
   0x2 LB: > { %s33_s18 = sadd.s32 1, %s1721_s16  ;;  %p1363_p0 = scmp.ge.s32.totalorder %s1725_s17, 1  ;;  %s1725_s17 = sphi %s1757_s17, %s14_s17   ;;  %s1721_s16 = sphi %s1755_s16, %s2082_s16   ;;  %s1717_s15 = sphi %s1753_s15, %s2081_s15  }
   0x3   : > { %p35_p1 = scmp.ge.s32.totalorder %s33_s18, 2  ;;  %p224_p2 = scmp.lt.s32.totalorder %s1725_s17, 3 }
   0x5   : > { %s2084_s18 = smov (%p35_p1, %s33_s18), 0  ;;  %p225_p3 = pnand %p1363_p0, %p224_p2 }
   0x6   : > { %s1364_s21 = sshll.u32 (!%p225_p3), %s1717_s15, 5 }
   0x7   : > { %228 = sbr.rel (%p225_p3) target bundleno = 322 (0x142), region = 36  ;;  %p274_p4 = scmp.lt.s32.totalorder (!%p225_p3), %s1364_s21, 63 }
   0xc   : > { %v1639_v0 = vld [vmem:[%s2077_s1 + $0x78] sm:$0xff]   ;;  %v1641_v2 = vld [vmem:[%s2077_s1 + $0x70] sm:$0xff]   ;;  %v1643_v4 = vld [vmem:[%s2077_s1 + $0x68] sm:$0xff]   ;;  %s2086_s21 = smov (!%p274_p4, %s1364_s21), 63  ;;  %vm313_vm0 = vcmask 523264   ;;  %v1727_v48 = vmov 0.0  }
   0xd   : > { %v1640_v1 = vld [vmem:[%s2077_s1 + $0x38] sm:$0xff]   ;;  %1486 = vmatprep.subr.bf16.mxu0 %v1639_v0  ;;  %1598 = vmatprep.subr.bf16.mxu1 %v1639_v0  ;;  %v1642_v3 = vld [vmem:[%s2077_s1 + $0x30] sm:$0xff]   ;;  %v1644_v5 = vld [vmem:[%s2077_s1 + $0x28] sm:$0xff]   ;;  %s1453_s10 = sshll.u32 %s2086_s21, 3  ;;  %314 = vst.msk [vmem:[#allocation2] sm:$0xff] %vm313_vm0, %v1727_v48  ;;  %s1368_s12 = sshll.u32 %s2086_s21, 2 }
   0xe   : > { %1487 = vmatpush3.bf16.msra.mxu0 %v1640_v1  ;;  %1606 = vmatpush3.bf16.msra.mxu1 %v1640_v1  ;;  %v1645_v6 = vld [vmem:[%s2077_s1 + $0x60] sm:$0xff]   ;;  %v1647_v8 = vld [vmem:[%s2077_s1 + $0x58] sm:$0xff]   ;;  %s1804_s15 = scalar_lea.vmem %s2076_s0, %s1453_s10  ;;  %v1649_v10 = vld [vmem:[%s2077_s1 + $0x50] sm:$0xff]   ;;  %315 = vst.msk [vmem:[#allocation2 + $0x8] sm:$0xff] %vm313_vm0, %v1727_v48  ;;  %s1919_s14 = scalar_lea.vmem %s2080_s4, %s1368_s12  ;;  %vm1197_vm1 = vcmask 519168  }
   0xf   : > { %1488 = vmatprep.subr.bf16.mxu0 %v1641_v2  ;;  %1599 = vmatprep.subr.bf16.mxu1 %v1641_v2  ;;  %v1646_v7 = vld [vmem:[%s2077_s1 + $0x20] sm:$0xff]   ;;  %v1648_v9 = vld [vmem:[%s2077_s1 + $0x18] sm:$0xff]   ;;  %v1650_v13 = vld [vmem:[%s2077_s1 + $0x10] sm:$0xff]   ;;  %316 = vst.msk [vmem:[#allocation2 + $0x10] sm:$0xff] %vm313_vm0, %v1727_v48 }
  0x10   : > { %v1657_v11 = vld [vmem:[%s1804_s15 + $0x4] ss:$8 sps:$4 sm:$0xff]   ;;  %v1655_v18 = vld [vmem:[%s1804_s15] ss:$8 sps:$4 sm:$0xff]   ;;  %v1661_v20 = vld [vmem:[%s1804_s15 + $0x14] ss:$8 sps:$4 sm:$0xff]  }
  0x11   : > { %v1660_v12 = vld [vmem:[%s1804_s15 + $0x84] ss:$8 sps:$4 sm:$0xff]   ;;  %730 = vmatprep.mubr.bf16.mxu0 %v1657_v11  ;;  %v1658_v19 = vld [vmem:[%s1804_s15 + $0x80] ss:$8 sps:$4 sm:$0xff]   ;;  %v1663_v21 = vld [vmem:[%s1804_s15 + $0x94] ss:$8 sps:$4 sm:$0xff]  }
  0x12   : > { %1489 = vmatpush3.bf16.msra.mxu0 %v1642_v3  ;;  %1607 = vmatpush3.bf16.msra.mxu1 %v1642_v3  ;;  %v1651_v14 = vld [vmem:[%s2077_s1 + $0x48] sm:$0xff]   ;;  %v1653_v16 = vld [vmem:[%s2077_s1 + $0x40] sm:$0xff]   ;;  %v1665_v22 = vld [vmem:[%s1804_s15 + $0x10] ss:$8 sps:$4 sm:$0xff]   ;;  %317 = vst.msk [vmem:[#allocation2 + $0x18] sm:$0xff] %vm313_vm0, %v1727_v48 }
  0x13   : > { %1490 = vmatprep.subr.bf16.mxu0 %v1643_v4  ;;  %1600 = vmatprep.subr.bf16.mxu1 %v1643_v4  ;;  %v1652_v15 = vld [vmem:[%s2077_s1 + $0x8] sm:$0xff]   ;;  %v1654_v17 = vld [vmem:[%s2077_s1] sm:$0xff]   ;;  %v1666_v23 = vld [vmem:[%s1804_s15 + $0x90] ss:$8 sps:$4 sm:$0xff]   ;;  %318 = vst.msk [vmem:[#allocation2 + $0x20] sm:$0xff] %vm313_vm0, %v1727_v48 }
  0x14   : > { %794 = vmatprep.mubr.bf16.mxu1 %v1660_v12  ;;  %v1667_v24 = vld [vmem:[%s1804_s15 + $0x24] ss:$8 sps:$4 sm:$0xff]   ;;  %v1671_v26 = vld [vmem:[%s1804_s15 + $0x20] ss:$8 sps:$4 sm:$0xff]   ;;  %v1673_v28 = vld [vmem:[%s1804_s15 + $0x34] ss:$8 sps:$4 sm:$0xff]  }
  0x15   : > { %v1669_v25 = vld [vmem:[%s1804_s15 + $0xa4] ss:$8 sps:$4 sm:$0xff]   ;;  %v1672_v27 = vld [vmem:[%s1804_s15 + $0xa0] ss:$8 sps:$4 sm:$0xff]   ;;  %v1675_v29 = vld [vmem:[%s1804_s15 + $0xb4] ss:$8 sps:$4 sm:$0xff]  }
  0x16   : > { %1491 = vmatpush3.bf16.msra.mxu0 %v1644_v5  ;;  %1608 = vmatpush3.bf16.msra.mxu1 %v1644_v5  ;;  %v1677_v30 = vld [vmem:[%s1804_s15 + $0x30] ss:$8 sps:$4 sm:$0xff]   ;;  %v1679_v32 = vld [vmem:[%s1804_s15 + $0x44] ss:$8 sps:$4 sm:$0xff]   ;;  %v1683_v34 = vld [vmem:[%s1804_s15 + $0x40] ss:$8 sps:$4 sm:$0xff]  }
  0x17   : > { %1492 = vmatprep.subr.bf16.mxu0 %v1645_v6  ;;  %1601 = vmatprep.subr.bf16.mxu1 %v1645_v6  ;;  %v1678_v31 = vld [vmem:[%s1804_s15 + $0xb0] ss:$8 sps:$4 sm:$0xff]   ;;  %v1681_v33 = vld [vmem:[%s1804_s15 + $0xc4] ss:$8 sps:$4 sm:$0xff]   ;;  %v1684_v35 = vld [vmem:[%s1804_s15 + $0xc0] ss:$8 sps:$4 sm:$0xff]  }
  0x18   : > { %v1685_v36 = vld [vmem:[%s1804_s15 + $0x54] ss:$8 sps:$4 sm:$0xff]   ;;  %v1689_v38 = vld [vmem:[%s1804_s15 + $0x50] ss:$8 sps:$4 sm:$0xff]   ;;  %v1691_v40 = vld [vmem:[%s1804_s15 + $0x64] ss:$8 sps:$4 sm:$0xff]  }
  0x19   : > { %v1687_v37 = vld [vmem:[%s1804_s15 + $0xd4] ss:$8 sps:$4 sm:$0xff]   ;;  %v1690_v39 = vld [vmem:[%s1804_s15 + $0xd0] ss:$8 sps:$4 sm:$0xff]   ;;  %v1693_v41 = vld [vmem:[%s1804_s15 + $0xe4] ss:$8 sps:$4 sm:$0xff]  }
  0x1a   : > { %1493 = vmatpush3.bf16.msra.mxu0 %v1646_v7  ;;  %1609 = vmatpush3.bf16.msra.mxu1 %v1646_v7  ;;  %v1695_v42 = vld [vmem:[%s1804_s15 + $0x60] ss:$8 sps:$4 sm:$0xff]   ;;  %v1697_v44 = vld [vmem:[%s1804_s15 + $0x74] ss:$8 sps:$4 sm:$0xff]   ;;  %v1701_v46 = vld [vmem:[%s1804_s15 + $0x70] ss:$8 sps:$4 sm:$0xff]  }
  0x1b   : > { %1494 = vmatprep.subr.bf16.mxu0 %v1647_v8  ;;  %1602 = vmatprep.subr.bf16.mxu1 %v1647_v8  ;;  %v1696_v43 = vld [vmem:[%s1804_s15 + $0xe0] ss:$8 sps:$4 sm:$0xff]   ;;  %v1699_v45 = vld [vmem:[%s1804_s15 + $0xf4] ss:$8 sps:$4 sm:$0xff]   ;;  %v1702_v47 = vld [vmem:[%s1804_s15 + $0xf0] ss:$8 sps:$4 sm:$0xff]  }
  0x1c   : > { %319 = vst.msk [vmem:[#allocation2 + $0x28] sm:$0xff] %vm313_vm0, %v1727_v48  ;;  %320 = vst.msk [vmem:[#allocation2 + $0x30] sm:$0xff] %vm313_vm0, %v1727_v48  ;;  %v346_v51 = vld [vmem:[#allocation2] sm:$0xff]  ;;  %v347_v61 = vld [vmem:[#allocation2 + $0x8] sm:$0xff] }
  0x1d   : > { %321 = vst.msk [vmem:[#allocation2 + $0x38] sm:$0xff] %vm313_vm0, %v1727_v48  ;;  %322 = vst.msk [vmem:[#allocation2 + $0x40] sm:$0xff] %vm313_vm0, %v1727_v48  ;;  %v348_v7 = vld [vmem:[#allocation2 + $0x10] sm:$0xff] }
  0x1e   : > { %1495 = vmatpush3.bf16.msra.mxu0 %v1648_v9  ;;  %1610 = vmatpush3.bf16.msra.mxu1 %v1648_v9  ;;  %323 = vst.msk [vmem:[#allocation2 + $0x48] sm:$0xff] %vm313_vm0, %v1727_v48  ;;  %324 = vst.msk [vmem:[#allocation2 + $0x50] sm:$0xff] %vm313_vm0, %v1727_v48 }
  0x1f   : > { %1496 = vmatprep.subr.bf16.mxu0 %v1649_v10  ;;  %1603 = vmatprep.subr.bf16.mxu1 %v1649_v10  ;;  %325 = vst.msk [vmem:[#allocation2 + $0x58] sm:$0xff] %vm313_vm0, %v1727_v48  ;;  %326 = vst.msk [vmem:[#allocation2 + $0x60] sm:$0xff] %vm313_vm0, %v1727_v48 }
  0x20   : > { %327 = vst.msk [vmem:[#allocation2 + $0x68] sm:$0xff] %vm313_vm0, %v1727_v48  ;;  %328 = vst.msk [vmem:[#allocation2 + $0x70] sm:$0xff] %vm313_vm0, %v1727_v48 }
  0x21   : > { %329 = vst.msk [vmem:[#allocation2 + $0x78] sm:$0xff] %vm313_vm0, %v1727_v48  ;;  %330 = vst.msk [vmem:[#allocation2 + $0x80] sm:$0xff] %vm313_vm0, %v1727_v48 }
  0x22   : > { %1497 = vmatpush3.bf16.msra.mxu0 %v1650_v13  ;;  %1611 = vmatpush3.bf16.msra.mxu1 %v1650_v13  ;;  %331 = vst.msk [vmem:[#allocation2 + $0x88] sm:$0xff] %vm313_vm0, %v1727_v48  ;;  %332 = vst.msk [vmem:[#allocation2 + $0x90] sm:$0xff] %vm313_vm0, %v1727_v48  ;;  %v1898_v13 = vld [vmem:[%s2078_s2] ss:$0 sm:$0xff] }
  0x23   : > { %1498 = vmatprep.subr.bf16.mxu0 %v1651_v14  ;;  %1604 = vmatprep.subr.bf16.mxu1 %v1651_v14  ;;  %333 = vst.msk [vmem:[#allocation2 + $0x98] sm:$0xff] %vm313_vm0, %v1727_v48  ;;  %334 = vst.msk [vmem:[#allocation2 + $0xa0] sm:$0xff] %vm313_vm0, %v1727_v48 }
  0x24   : > { %335 = vst.msk [vmem:[#allocation2 + $0xa8] sm:$0xff] %vm313_vm0, %v1727_v48  ;;  %336 = vst.msk [vmem:[#allocation2 + $0xb0] sm:$0xff] %vm313_vm0, %v1727_v48 }
  0x25   : > { %337 = vst.msk [vmem:[#allocation2 + $0xb8] sm:$0xff] %vm313_vm0, %v1727_v48  ;;  %338 = vst.msk [vmem:[#allocation2 + $0xc0] sm:$0xff] %vm313_vm0, %v1727_v48 }
  0x26   : > { %1499 = vmatpush3.bf16.msra.mxu0 %v1652_v15  ;;  %1612 = vmatpush3.bf16.msra.mxu1 %v1652_v15  ;;  %339 = vst.msk [vmem:[#allocation2 + $0xc8] sm:$0xff] %vm313_vm0, %v1727_v48  ;;  %340 = vst.msk [vmem:[#allocation2 + $0xd0] sm:$0xff] %vm313_vm0, %v1727_v48 }
  0x27   : > { %1500 = vmatprep.subr.bf16.mxu0 %v1653_v16  ;;  %1605 = vmatprep.subr.bf16.mxu1 %v1653_v16  ;;  %341 = vst.msk [vmem:[#allocation2 + $0xd8] sm:$0xff] %vm313_vm0, %v1727_v48  ;;  %342 = vst.msk [vmem:[#allocation2 + $0xe0] sm:$0xff] %vm313_vm0, %v1727_v48  ;;  %v1903_v16 = vld [vmem:[%s2079_s3] ss:$0 sm:$0xff] }
  0x28   : > { %343 = vst.msk [vmem:[#allocation2 + $0xe8] sm:$0xff] %vm313_vm0, %v1727_v48  ;;  %344 = vst.msk [vmem:[#allocation2 + $0xf0] sm:$0xff] %vm313_vm0, %v1727_v48  ;;  %v362_v53 = vld [vmem:[#allocation2 + $0x80] sm:$0xff] }
  0x29   : > { %345 = vst.msk [vmem:[#allocation2 + $0xf8] sm:$0xff] %vm313_vm0, %v1727_v48  ;;  %v363_v63 = vld [vmem:[#allocation2 + $0x88] sm:$0xff]  ;;  %v364_v9 = vld [vmem:[#allocation2 + $0x90] sm:$0xff] }
  0x2a   : > { %1501 = vmatpush3.bf16.msra.mxu0 %v1654_v17  ;;  %1613 = vmatpush3.bf16.msra.mxu1 %v1654_v17 }
  0x2d   : > { %731 = vmatmul.mubr.bf16.vlgmr.msra.gmra.mxu0 %v1655_v18  ;;  %795 = vmatmul.mubr.bf16.vlgmr.msra.gmra.mxu1 %v1658_v19  ;;  %v349_v19 = vld [vmem:[#allocation2 + $0x18] sm:$0xff] }
  0x2e   : > { %738 = vmatprep.mubr.bf16.mxu0 %v1661_v20  ;;  %802 = vmatprep.mubr.bf16.mxu1 %v1663_v21 }
  0x35   : > { %739 = vmatmul.mubr.bf16.gmra.mxu0 %v1665_v22  ;;  %803 = vmatmul.mubr.bf16.gmra.mxu1 %v1666_v23  ;;  %v365_v23 = vld [vmem:[#allocation2 + $0x98] sm:$0xff] }
  0x36   : > { %746 = vmatprep.mubr.bf16.mxu0 %v1667_v24  ;;  %810 = vmatprep.mubr.bf16.mxu1 %v1669_v25 }
  0x3d   : > { %747 = vmatmul.mubr.bf16.gmra.mxu0 %v1671_v26  ;;  %811 = vmatmul.mubr.bf16.gmra.mxu1 %v1672_v27 }
  0x3e   : > { %754 = vmatprep.mubr.bf16.mxu0 %v1673_v28  ;;  %818 = vmatprep.mubr.bf16.mxu1 %v1675_v29 }
  0x45   : > { %755 = vmatmul.mubr.bf16.gmra.mxu0 %v1677_v30  ;;  %819 = vmatmul.mubr.bf16.gmra.mxu1 %v1678_v31 }
  0x46   : > { %762 = vmatprep.mubr.bf16.mxu0 %v1679_v32  ;;  %826 = vmatprep.mubr.bf16.mxu1 %v1681_v33 }
  0x4d   : > { %763 = vmatmul.mubr.bf16.gmra.mxu0 %v1683_v34  ;;  %827 = vmatmul.mubr.bf16.gmra.mxu1 %v1684_v35 }
  0x4e   : > { %770 = vmatprep.mubr.bf16.mxu0 %v1685_v36  ;;  %834 = vmatprep.mubr.bf16.mxu1 %v1687_v37 }
  0x55   : > { %771 = vmatmul.mubr.bf16.gmra.mxu0 %v1689_v38  ;;  %835 = vmatmul.mubr.bf16.gmra.mxu1 %v1690_v39 }
  0x56   : > { %778 = vmatprep.mubr.bf16.mxu0 %v1691_v40  ;;  %842 = vmatprep.mubr.bf16.mxu1 %v1693_v41 }
  0x5d   : > { %779 = vmatmul.mubr.bf16.gmra.mxu0 %v1695_v42  ;;  %843 = vmatmul.mubr.bf16.gmra.mxu1 %v1696_v43  ;;  %v350_v43 = vld [vmem:[#allocation2 + $0x20] sm:$0xff] }
  0x5e   : > { %786 = vmatprep.mubr.bf16.mxu0 %v1697_v44  ;;  %850 = vmatprep.mubr.bf16.mxu1 %v1699_v45  ;;  %v366_v44 = vld [vmem:[#allocation2 + $0xa0] sm:$0xff] }
  0x65   : > { %787 = vmatmul.mubr.bf16.gmra.mxu0 %v1701_v46  ;;  %851 = vmatmul.mubr.bf16.gmra.mxu1 %v1702_v47 }
  0xed   : > { %v1502_v49 = vpop.f32.mrf.mxu0  ;;  %v1550_v50 = vpop.f32.mrf.mxu1 }
  0xef   : > { %v1503_v52 = vpop.f32.mrf.mxu0  ;;  %v1551_v54 = vpop.f32.mrf.mxu1 }
  0xf0   : > { %v1504_v55 = vadd.f32 %v1503_v52, %v1502_v49  ;;  %v1552_v56 = vadd.f32 %v1551_v54, %v1550_v50 }
  0xf1   : > { %v1505_v57 = vpop.f32.mrf.mxu0  ;;  %v1553_v58 = vpop.f32.mrf.mxu1 }
  0xf2   : > { %v859_v59 = vadd.f32 %v1504_v55, %v346_v51  ;;  %v875_v60 = vadd.f32 %v1552_v56, %v362_v53 }
  0xf3   : > { %v1506_v62 = vpop.f32.mrf.mxu0  ;;  %v1554_v0 = vpop.f32.mrf.mxu1 }
  0xf4   : > { %892 = vst.msk [vmem:[#allocation2] sm:$0xff] %vm313_vm0, %v859_v59  ;;  %908 = vst.msk [vmem:[#allocation2 + $0x80] sm:$0xff] %vm313_vm0, %v875_v60  ;;  %v1507_v1 = vadd.f32 %v1506_v62, %v1505_v57  ;;  %v1555_v2 = vadd.f32 %v1554_v0, %v1553_v58  ;;  %v367_v0 = vld [vmem:[#allocation2 + $0xa8] sm:$0xff] }
  0xf5   : > { %v1508_v3 = vpop.f32.mrf.mxu0  ;;  %v1556_v4 = vpop.f32.mrf.mxu1 }
  0xf6   : > { %v860_v5 = vadd.f32 %v1507_v1, %v347_v61  ;;  %v876_v6 = vadd.f32 %v1555_v2, %v363_v63  ;;  %v351_v63 = vld [vmem:[#allocation2 + $0x28] sm:$0xff] }
  0xf7   : > { %v1509_v8 = vpop.f32.mrf.mxu0  ;;  %v1557_v10 = vpop.f32.mrf.mxu1 }
  0xf8   : > { %893 = vst.msk [vmem:[#allocation2 + $0x8] sm:$0xff] %vm313_vm0, %v860_v5  ;;  %909 = vst.msk [vmem:[#allocation2 + $0x88] sm:$0xff] %vm313_vm0, %v876_v6  ;;  %v1510_v11 = vadd.f32 %v1509_v8, %v1508_v3  ;;  %v1558_v12 = vadd.f32 %v1557_v10, %v1556_v4 }
  0xf9   : > { %v1511_v14 = vpop.f32.mrf.mxu0  ;;  %v1559_v15 = vpop.f32.mrf.mxu1 }
  0xfa   : > { %v861_v17 = vadd.f32 %v1510_v11, %v348_v7  ;;  %v877_v18 = vadd.f32 %v1558_v12, %v364_v9 }
  0xfb   : > { %v927_v20 = vld [vmem:[#allocation2] sm:$0xff]  ;;  %v1512_v22 = vpop.f32.mrf.mxu0  ;;  %v1560_v24 = vpop.f32.mrf.mxu1 }
  0xfc   : > { %v943_v21 = vld [vmem:[#allocation2 + $0x80] sm:$0xff]  ;;  %v966_v25 = vmul.f32 %v1898_v13, %v927_v20  ;;  %894 = vst.msk [vmem:[#allocation2 + $0x10] sm:$0xff] %vm313_vm0, %v861_v17  ;;  %910 = vst.msk [vmem:[#allocation2 + $0x90] sm:$0xff] %vm313_vm0, %v877_v18  ;;  %v1513_v27 = vadd.f32 %v1512_v22, %v1511_v14  ;;  %v1561_v28 = vadd.f32 %v1560_v24, %v1559_v15  ;;  %v368_v22 = vld [vmem:[#allocation2 + $0xb0] sm:$0xff] }
  0xfd   : > { %v982_v26 = vmul.f32 %v1898_v13, %v943_v21  ;;  %v1514_v29 = vpop.f32.mrf.mxu0  ;;  %v1562_v30 = vpop.f32.mrf.mxu1  ;;  %v352_v21 = vld [vmem:[#allocation2 + $0x30] sm:$0xff] }
  0xfe   : > { %v1005_v31 = vadd.f32 %v1903_v16, %v966_v25  ;;  %v862_v33 = vadd.f32 %v1513_v27, %v349_v19  ;;  %v878_v34 = vadd.f32 %v1561_v28, %v365_v23 }
  0xff   : > { %v1021_v32 = vadd.f32 %v1903_v16, %v982_v26  ;;  %v928_v35 = vld [vmem:[#allocation2 + $0x8] sm:$0xff]  ;;  %v1515_v37 = vpop.f32.mrf.mxu0  ;;  %v1563_v38 = vpop.f32.mrf.mxu1 }
 0x100   : > { %v944_v36 = vld [vmem:[#allocation2 + $0x88] sm:$0xff]  ;;  %v1037_v39 = vmax.f32 %v1005_v31, 0.0  ;;  %v967_v41 = vmul.f32 %v1898_v13, %v928_v35  ;;  %895 = vst.msk [vmem:[#allocation2 + $0x18] sm:$0xff] %vm313_vm0, %v862_v33  ;;  %911 = vst.msk [vmem:[#allocation2 + $0x98] sm:$0xff] %vm313_vm0, %v878_v34  ;;  %v1516_v45 = vadd.f32 %v1515_v37, %v1514_v29  ;;  %v1564_v46 = vadd.f32 %v1563_v38, %v1562_v30  ;;  %v353_v33 = vld [vmem:[#allocation2 + $0x38] sm:$0xff] }
 0x101   : > { %v1053_v40 = vmax.f32 %v1021_v32, 0.0  ;;  %v983_v42 = vmul.f32 %v1898_v13, %v944_v36  ;;  %v1517_v47 = vpop.f32.mrf.mxu0  ;;  %v1565_v48 = vpop.f32.mrf.mxu1  ;;  %v369_v35 = vld [vmem:[#allocation2 + $0xb8] sm:$0xff] }
 0x102   : > { %v1454_v49 = vpack.c.bf16 %v1037_v39, %v1037_v39  ;;  %v1006_v51 = vadd.f32 %v1903_v16, %v967_v41  ;;  %v863_v55 = vadd.f32 %v1516_v45, %v350_v43  ;;  %v879_v56 = vadd.f32 %v1564_v46, %v366_v44 }
 0x103   : > { %v1470_v50 = vpack.c.bf16 %v1053_v40, %v1053_v40  ;;  %v1022_v52 = vadd.f32 %v1903_v16, %v983_v42  ;;  %v929_v53 = vld [vmem:[#allocation2 + $0x10] sm:$0xff]  ;;  %v1518_v57 = vpop.f32.mrf.mxu0  ;;  %v1566_v58 = vpop.f32.mrf.mxu1 }
 0x104   : > { %v945_v54 = vld [vmem:[#allocation2 + $0x90] sm:$0xff]  ;;  %1198 = vst.msk [vmem:[%s1919_s14] sm:$0xf] %vm1197_vm1, %v1454_v49  ;;  %v1038_v59 = vmax.f32 %v1006_v51, 0.0  ;;  %v968_v61 = vmul.f32 %v1898_v13, %v929_v53  ;;  %v1519_v1 = vadd.f32 %v1518_v57, %v1517_v47  ;;  %v1567_v2 = vadd.f32 %v1566_v58, %v1565_v48  ;;  %v354_v53 = vld [vmem:[#allocation2 + $0x40] sm:$0xff] }
 0x105   : > { %1214 = vst.msk [vmem:[%s1919_s14 + $0x40] sm:$0xf] %vm1197_vm1, %v1470_v50  ;;  %v1054_v60 = vmax.f32 %v1022_v52, 0.0  ;;  %v984_v62 = vmul.f32 %v1898_v13, %v945_v54  ;;  %v1520_v3 = vpop.f32.mrf.mxu0  ;;  %v1568_v4 = vpop.f32.mrf.mxu1 }
 0x106   : > { %896 = vst.msk [vmem:[#allocation2 + $0x20] sm:$0xff] %vm313_vm0, %v863_v55  ;;  %912 = vst.msk [vmem:[#allocation2 + $0xa0] sm:$0xff] %vm313_vm0, %v879_v56  ;;  %v1455_v5 = vpack.c.bf16 %v1038_v59, %v1038_v59  ;;  %v1007_v7 = vadd.f32 %v1903_v16, %v968_v61  ;;  %v864_v11 = vadd.f32 %v1519_v1, %v351_v63  ;;  %v370_v55 = vld [vmem:[#allocation2 + $0xc0] sm:$0xff] }
 0x107   : > { %v1471_v6 = vpack.c.bf16 %v1054_v60, %v1054_v60  ;;  %v1023_v8 = vadd.f32 %v1903_v16, %v984_v62  ;;  %v930_v9 = vld [vmem:[#allocation2 + $0x18] sm:$0xff]  ;;  %v880_v12 = vadd.f32 %v1567_v2, %v367_v0  ;;  %v1521_v14 = vpop.f32.mrf.mxu0  ;;  %v1569_v15 = vpop.f32.mrf.mxu1 }
 0x108   : > { %v946_v10 = vld [vmem:[#allocation2 + $0x98] sm:$0xff]  ;;  %1199 = vst.msk [vmem:[%s1919_s14 + $0x4] sm:$0xf] %vm1197_vm1, %v1455_v5  ;;  %v1039_v17 = vmax.f32 %v1007_v7, 0.0  ;;  %v969_v19 = vmul.f32 %v1898_v13, %v930_v9  ;;  %v1522_v23 = vadd.f32 %v1521_v14, %v1520_v3  ;;  %v1570_v24 = vadd.f32 %v1569_v15, %v1568_v4  ;;  %v355_v9 = vld [vmem:[#allocation2 + $0x48] sm:$0xff] }
 0x109   : > { %1215 = vst.msk [vmem:[%s1919_s14 + $0x44] sm:$0xf] %vm1197_vm1, %v1471_v6  ;;  %v1055_v18 = vmax.f32 %v1023_v8, 0.0  ;;  %v985_v20 = vmul.f32 %v1898_v13, %v946_v10  ;;  %v1523_v25 = vpop.f32.mrf.mxu0  ;;  %v1571_v26 = vpop.f32.mrf.mxu1 }
 0x10a   : > { %897 = vst.msk [vmem:[#allocation2 + $0x28] sm:$0xff] %vm313_vm0, %v864_v11  ;;  %913 = vst.msk [vmem:[#allocation2 + $0xa8] sm:$0xff] %vm313_vm0, %v880_v12  ;;  %v1456_v27 = vpack.c.bf16 %v1039_v17, %v1039_v17  ;;  %v1008_v29 = vadd.f32 %v1903_v16, %v969_v19  ;;  %v865_v31 = vadd.f32 %v1522_v23, %v352_v21  ;;  %v371_v11 = vld [vmem:[#allocation2 + $0xc8] sm:$0xff] }
 0x10b   : > { %v1472_v28 = vpack.c.bf16 %v1055_v18, %v1055_v18  ;;  %v1024_v30 = vadd.f32 %v1903_v16, %v985_v20  ;;  %v881_v32 = vadd.f32 %v1570_v24, %v368_v22  ;;  %v1524_v34 = vpop.f32.mrf.mxu0  ;;  %v1572_v36 = vpop.f32.mrf.mxu1 }
 0x10c   : > { %1200 = vst.msk [vmem:[%s1919_s14 + $0x8] sm:$0xf] %vm1197_vm1, %v1456_v27  ;;  %v1040_v37 = vmax.f32 %v1008_v29, 0.0  ;;  %v1525_v41 = vadd.f32 %v1524_v34, %v1523_v25  ;;  %v1573_v42 = vadd.f32 %v1572_v36, %v1571_v26  ;;  %v356_v27 = vld [vmem:[#allocation2 + $0x50] sm:$0xff] }
 0x10d   : > { %1216 = vst.msk [vmem:[%s1919_s14 + $0x48] sm:$0xf] %vm1197_vm1, %v1472_v28  ;;  %v1056_v38 = vmax.f32 %v1024_v30, 0.0  ;;  %v931_v39 = vld [vmem:[#allocation2 + $0x20] sm:$0xff]  ;;  %v1526_v45 = vpop.f32.mrf.mxu0  ;;  %v1574_v46 = vpop.f32.mrf.mxu1 }
 0x10e   : > { %v947_v40 = vld [vmem:[#allocation2 + $0xa0] sm:$0xff]  ;;  %v970_v43 = vmul.f32 %v1898_v13, %v931_v39  ;;  %898 = vst.msk [vmem:[#allocation2 + $0x30] sm:$0xff] %vm313_vm0, %v865_v31  ;;  %914 = vst.msk [vmem:[#allocation2 + $0xb0] sm:$0xff] %vm313_vm0, %v881_v32  ;;  %v1457_v47 = vpack.c.bf16 %v1040_v37, %v1040_v37  ;;  %v866_v49 = vadd.f32 %v1525_v41, %v353_v33 }
 0x10f   : > { %v986_v44 = vmul.f32 %v1898_v13, %v947_v40  ;;  %v1473_v48 = vpack.c.bf16 %v1056_v38, %v1056_v38  ;;  %v882_v50 = vadd.f32 %v1573_v42, %v369_v35  ;;  %v1527_v54 = vpop.f32.mrf.mxu0  ;;  %v1575_v56 = vpop.f32.mrf.mxu1  ;;  %v372_v35 = vld [vmem:[#allocation2 + $0xd0] sm:$0xff] }
 0x110   : > { %v1009_v51 = vadd.f32 %v1903_v16, %v970_v43  ;;  %1201 = vst.msk [vmem:[%s1919_s14 + $0xc] sm:$0xf] %vm1197_vm1, %v1457_v47  ;;  %v1528_v59 = vadd.f32 %v1527_v54, %v1526_v45  ;;  %v1576_v60 = vadd.f32 %v1575_v56, %v1574_v46 }
 0x111   : > { %v1025_v52 = vadd.f32 %v1903_v16, %v986_v44  ;;  %1217 = vst.msk [vmem:[%s1919_s14 + $0x4c] sm:$0xf] %vm1197_vm1, %v1473_v48  ;;  %v932_v57 = vld [vmem:[#allocation2 + $0x28] sm:$0xff]  ;;  %v1529_v1 = vpop.f32.mrf.mxu0  ;;  %v1577_v2 = vpop.f32.mrf.mxu1 }
 0x112   : > { %v948_v58 = vld [vmem:[#allocation2 + $0xa8] sm:$0xff]  ;;  %899 = vst.msk [vmem:[#allocation2 + $0x38] sm:$0xff] %vm313_vm0, %v866_v49  ;;  %915 = vst.msk [vmem:[#allocation2 + $0xb8] sm:$0xff] %vm313_vm0, %v882_v50  ;;  %v1041_v61 = vmax.f32 %v1009_v51, 0.0  ;;  %v971_v63 = vmul.f32 %v1898_v13, %v932_v57  ;;  %v867_v3 = vadd.f32 %v1528_v59, %v354_v53  ;;  %v883_v4 = vadd.f32 %v1576_v60, %v370_v55  ;;  %v357_v59 = vld [vmem:[#allocation2 + $0x58] sm:$0xff] }
 0x113   : > { %v1057_v62 = vmax.f32 %v1025_v52, 0.0  ;;  %v987_v0 = vmul.f32 %v1898_v13, %v948_v58  ;;  %v1530_v10 = vpop.f32.mrf.mxu0  ;;  %v1578_v12 = vpop.f32.mrf.mxu1  ;;  %v373_v60 = vld [vmem:[#allocation2 + $0xd8] sm:$0xff] }
 0x114   : > { %v1458_v5 = vpack.c.bf16 %v1041_v61, %v1041_v61  ;;  %v1010_v7 = vadd.f32 %v1903_v16, %v971_v63  ;;  %900 = vst.msk [vmem:[#allocation2 + $0x40] sm:$0xff] %vm313_vm0, %v867_v3  ;;  %916 = vst.msk [vmem:[#allocation2 + $0xc0] sm:$0xff] %vm313_vm0, %v883_v4  ;;  %v1531_v17 = vadd.f32 %v1530_v10, %v1529_v1 }
 0x115   : > { %v1474_v6 = vpack.c.bf16 %v1057_v62, %v1057_v62  ;;  %v1026_v8 = vadd.f32 %v1903_v16, %v987_v0  ;;  %v933_v14 = vld [vmem:[#allocation2 + $0x30] sm:$0xff]  ;;  %v1579_v18 = vadd.f32 %v1578_v12, %v1577_v2  ;;  %v1532_v23 = vpop.f32.mrf.mxu0  ;;  %v1580_v24 = vpop.f32.mrf.mxu1 }
 0x116   : > { %v949_v15 = vld [vmem:[#allocation2 + $0xb0] sm:$0xff]  ;;  %1202 = vst.msk [vmem:[%s1919_s14 + $0x10] sm:$0xf] %vm1197_vm1, %v1458_v5  ;;  %v1042_v19 = vmax.f32 %v1010_v7, 0.0  ;;  %v972_v21 = vmul.f32 %v1898_v13, %v933_v14  ;;  %v868_v25 = vadd.f32 %v1531_v17, %v355_v9  ;;  %v358_v17 = vld [vmem:[#allocation2 + $0x60] sm:$0xff] }
 0x117   : > { %1218 = vst.msk [vmem:[%s1919_s14 + $0x50] sm:$0xf] %vm1197_vm1, %v1474_v6  ;;  %v1058_v20 = vmax.f32 %v1026_v8, 0.0  ;;  %v988_v22 = vmul.f32 %v1898_v13, %v949_v15  ;;  %v884_v26 = vadd.f32 %v1579_v18, %v371_v11  ;;  %v1533_v34 = vpop.f32.mrf.mxu0  ;;  %v1581_v36 = vpop.f32.mrf.mxu1  ;;  %v374_v18 = vld [vmem:[#allocation2 + $0xe0] sm:$0xff] }
 0x118   : > { %v1459_v28 = vpack.c.bf16 %v1042_v19, %v1042_v19  ;;  %v1011_v30 = vadd.f32 %v1903_v16, %v972_v21  ;;  %901 = vst.msk [vmem:[#allocation2 + $0x48] sm:$0xff] %vm313_vm0, %v868_v25  ;;  %v1534_v39 = vadd.f32 %v1533_v34, %v1532_v23  ;;  %v1582_v40 = vadd.f32 %v1581_v36, %v1580_v24 }
 0x119   : > { %v1475_v29 = vpack.c.bf16 %v1058_v20, %v1058_v20  ;;  %v1027_v31 = vadd.f32 %v1903_v16, %v988_v22  ;;  %v934_v32 = vld [vmem:[#allocation2 + $0x38] sm:$0xff]  ;;  %917 = vst.msk [vmem:[#allocation2 + $0xc8] sm:$0xff] %vm313_vm0, %v884_v26  ;;  %v1535_v43 = vpop.f32.mrf.mxu0  ;;  %v1583_v44 = vpop.f32.mrf.mxu1 }
 0x11a   : > { %v950_v33 = vld [vmem:[#allocation2 + $0xb8] sm:$0xff]  ;;  %v973_v37 = vmul.f32 %v1898_v13, %v934_v32  ;;  %1203 = vst.msk [vmem:[%s1919_s14 + $0x14] sm:$0xf] %vm1197_vm1, %v1459_v28  ;;  %v1043_v41 = vmax.f32 %v1011_v30, 0.0  ;;  %v869_v47 = vadd.f32 %v1534_v39, %v356_v27  ;;  %v885_v48 = vadd.f32 %v1582_v40, %v372_v35 }
 0x11b   : > { %v989_v38 = vmul.f32 %v1898_v13, %v950_v33  ;;  %1219 = vst.msk [vmem:[%s1919_s14 + $0x54] sm:$0xf] %vm1197_vm1, %v1475_v29  ;;  %v1059_v42 = vmax.f32 %v1027_v31, 0.0  ;;  %v935_v51 = vld [vmem:[#allocation2 + $0x40] sm:$0xff]  ;;  %v1536_v53 = vpop.f32.mrf.mxu0  ;;  %v1584_v54 = vpop.f32.mrf.mxu1 }
 0x11c   : > { %v1012_v45 = vadd.f32 %v1903_v16, %v973_v37  ;;  %v1460_v49 = vpack.c.bf16 %v1043_v41, %v1043_v41  ;;  %v951_v52 = vld [vmem:[#allocation2 + $0xc0] sm:$0xff]  ;;  %v974_v57 = vmul.f32 %v1898_v13, %v935_v51  ;;  %902 = vst.msk [vmem:[#allocation2 + $0x50] sm:$0xff] %vm313_vm0, %v869_v47  ;;  %918 = vst.msk [vmem:[#allocation2 + $0xd0] sm:$0xff] %vm313_vm0, %v885_v48  ;;  %v359_v37 = vld [vmem:[#allocation2 + $0x68] sm:$0xff] }
 0x11d   : > { %v1028_v46 = vadd.f32 %v1903_v16, %v989_v38  ;;  %v1476_v50 = vpack.c.bf16 %v1059_v42, %v1059_v42  ;;  %v990_v58 = vmul.f32 %v1898_v13, %v951_v52  ;;  %v1537_v61 = vadd.f32 %v1536_v53, %v1535_v43  ;;  %v1538_v63 = vpop.f32.mrf.mxu0  ;;  %v1586_v0 = vpop.f32.mrf.mxu1  ;;  %v375_v38 = vld [vmem:[#allocation2 + $0xe8] sm:$0xff]  ;;  %v376_v51 = vld [vmem:[#allocation2 + $0xf0] sm:$0xff] }
 0x11e   : > { %v1044_v55 = vmax.f32 %v1012_v45, 0.0  ;;  %1204 = vst.msk [vmem:[%s1919_s14 + $0x18] sm:$0xf] %vm1197_vm1, %v1460_v49  ;;  %v1585_v62 = vadd.f32 %v1584_v54, %v1583_v44  ;;  %v1013_v3 = vadd.f32 %v1903_v16, %v974_v57  ;;  %v360_v49 = vld [vmem:[#allocation2 + $0x70] sm:$0xff] }
 0x11f   : > { %v1060_v56 = vmax.f32 %v1028_v46, 0.0  ;;  %1220 = vst.msk [vmem:[%s1919_s14 + $0x58] sm:$0xf] %vm1197_vm1, %v1476_v50  ;;  %v1029_v4 = vadd.f32 %v1903_v16, %v990_v58  ;;  %v936_v5 = vld [vmem:[#allocation2 + $0x48] sm:$0xff]  ;;  %v870_v7 = vadd.f32 %v1537_v61, %v357_v59  ;;  %v1539_v9 = vpop.f32.mrf.mxu0  ;;  %v1587_v10 = vpop.f32.mrf.mxu1 }
 0x120   : > { %v1461_v1 = vpack.c.bf16 %v1044_v55, %v1044_v55  ;;  %v952_v6 = vld [vmem:[#allocation2 + $0xc8] sm:$0xff]  ;;  %v886_v8 = vadd.f32 %v1585_v62, %v373_v60  ;;  %v1045_v11 = vmax.f32 %v1013_v3, 0.0  ;;  %v975_v14 = vmul.f32 %v1898_v13, %v936_v5  ;;  %v361_v5 = vld [vmem:[#allocation2 + $0x78] sm:$0xff] }
 0x121   : > { %v1477_v2 = vpack.c.bf16 %v1060_v56, %v1060_v56  ;;  %v1061_v12 = vmax.f32 %v1029_v4, 0.0  ;;  %v991_v15 = vmul.f32 %v1898_v13, %v952_v6  ;;  %903 = vst.msk [vmem:[#allocation2 + $0x58] sm:$0xff] %vm313_vm0, %v870_v7  ;;  %v1540_v19 = vadd.f32 %v1539_v9, %v1538_v63  ;;  %v1541_v21 = vpop.f32.mrf.mxu0  ;;  %v1589_v22 = vpop.f32.mrf.mxu1  ;;  %v377_v7 = vld [vmem:[#allocation2 + $0xf8] sm:$0xff] }
 0x122   : > { %1205 = vst.msk [vmem:[%s1919_s14 + $0x1c] sm:$0xf] %vm1197_vm1, %v1461_v1  ;;  %v1588_v20 = vadd.f32 %v1587_v10, %v1586_v0  ;;  %v1462_v23 = vpack.c.bf16 %v1045_v11, %v1045_v11  ;;  %v1014_v25 = vadd.f32 %v1903_v16, %v975_v14 }
 0x123   : > { %1221 = vst.msk [vmem:[%s1919_s14 + $0x5c] sm:$0xf] %vm1197_vm1, %v1477_v2  ;;  %v1478_v24 = vpack.c.bf16 %v1061_v12, %v1061_v12  ;;  %v1030_v26 = vadd.f32 %v1903_v16, %v991_v15  ;;  %v937_v27 = vld [vmem:[#allocation2 + $0x50] sm:$0xff]  ;;  %v871_v29 = vadd.f32 %v1540_v19, %v358_v17  ;;  %v1542_v31 = vpop.f32.mrf.mxu0  ;;  %v1590_v32 = vpop.f32.mrf.mxu1 }
 0x124   : > { %919 = vst.msk [vmem:[#allocation2 + $0xd8] sm:$0xff] %vm313_vm0, %v886_v8  ;;  %v953_v28 = vld [vmem:[#allocation2 + $0xd0] sm:$0xff]  ;;  %v887_v30 = vadd.f32 %v1588_v20, %v374_v18  ;;  %v1046_v33 = vmax.f32 %v1014_v25, 0.0  ;;  %v976_v35 = vmul.f32 %v1898_v13, %v937_v27  ;;  %v1543_v39 = vadd.f32 %v1542_v31, %v1541_v21 }
 0x125   : > { %1206 = vst.msk [vmem:[%s1919_s14 + $0x20] sm:$0xf] %vm1197_vm1, %v1462_v23  ;;  %1222 = vst.msk [vmem:[%s1919_s14 + $0x60] sm:$0xf] %vm1197_vm1, %v1478_v24  ;;  %v1062_v34 = vmax.f32 %v1030_v26, 0.0  ;;  %v992_v36 = vmul.f32 %v1898_v13, %v953_v28  ;;  %v1591_v40 = vadd.f32 %v1590_v32, %v1589_v22  ;;  %v1544_v41 = vpop.f32.mrf.mxu0  ;;  %v1592_v42 = vpop.f32.mrf.mxu1 }
 0x126   : > { %904 = vst.msk [vmem:[#allocation2 + $0x60] sm:$0xff] %vm313_vm0, %v871_v29  ;;  %920 = vst.msk [vmem:[#allocation2 + $0xe0] sm:$0xff] %vm313_vm0, %v887_v30  ;;  %v1463_v43 = vpack.c.bf16 %v1046_v33, %v1046_v33  ;;  %v1015_v45 = vadd.f32 %v1903_v16, %v976_v35  ;;  %v872_v47 = vadd.f32 %v1543_v39, %v359_v37 }
 0x127   : > { %v1479_v44 = vpack.c.bf16 %v1062_v34, %v1062_v34  ;;  %v1031_v46 = vadd.f32 %v1903_v16, %v992_v36  ;;  %v888_v48 = vadd.f32 %v1591_v40, %v375_v38  ;;  %v1545_v50 = vpop.f32.mrf.mxu0  ;;  %v1593_v52 = vpop.f32.mrf.mxu1 }
 0x128   : > { %1207 = vst.msk [vmem:[%s1919_s14 + $0x24] sm:$0xf] %vm1197_vm1, %v1463_v43  ;;  %v1047_v53 = vmax.f32 %v1015_v45, 0.0  ;;  %v938_v55 = vld [vmem:[#allocation2 + $0x58] sm:$0xff]  ;;  %v1546_v57 = vadd.f32 %v1545_v50, %v1544_v41  ;;  %v1594_v58 = vadd.f32 %v1593_v52, %v1592_v42 }
 0x129   : > { %1223 = vst.msk [vmem:[%s1919_s14 + $0x64] sm:$0xf] %vm1197_vm1, %v1479_v44  ;;  %v1063_v54 = vmax.f32 %v1031_v46, 0.0  ;;  %v977_v59 = vmul.f32 %v1898_v13, %v938_v55  ;;  %v1547_v61 = vpop.f32.mrf.mxu0  ;;  %v1595_v62 = vpop.f32.mrf.mxu1 }
 0x12a   : > { %905 = vst.msk [vmem:[#allocation2 + $0x68] sm:$0xff] %vm313_vm0, %v872_v47  ;;  %921 = vst.msk [vmem:[#allocation2 + $0xe8] sm:$0xff] %vm313_vm0, %v888_v48  ;;  %v1464_v63 = vpack.c.bf16 %v1047_v53, %v1047_v53  ;;  %v873_v1 = vadd.f32 %v1546_v57, %v360_v49  ;;  %v889_v2 = vadd.f32 %v1594_v58, %v376_v51 }
 0x12b   : > { %v954_v56 = vld [vmem:[#allocation2 + $0xd8] sm:$0xff]  ;;  %v1480_v0 = vpack.c.bf16 %v1063_v54, %v1063_v54  ;;  %v1016_v3 = vadd.f32 %v1903_v16, %v977_v59  ;;  %v1548_v6 = vpop.f32.mrf.mxu0  ;;  %v1596_v8 = vpop.f32.mrf.mxu1 }
 0x12c   : > { %v993_v60 = vmul.f32 %v1898_v13, %v954_v56  ;;  %1208 = vst.msk [vmem:[%s1919_s14 + $0x28] sm:$0xf] %vm1197_vm1, %v1464_v63  ;;  %v1549_v11 = vadd.f32 %v1548_v6, %v1547_v61  ;;  %v1597_v12 = vadd.f32 %v1596_v8, %v1595_v62 }
 0x12d   : > { %1224 = vst.msk [vmem:[%s1919_s14 + $0x68] sm:$0xf] %vm1197_vm1, %v1480_v0  ;;  %v939_v9 = vld [vmem:[#allocation2 + $0x60] sm:$0xff]  ;;  %v1048_v14 = vmax.f32 %v1016_v3, 0.0 }
 0x12e   : > { %v1032_v4 = vadd.f32 %v1903_v16, %v993_v60  ;;  %v955_v10 = vld [vmem:[#allocation2 + $0xe0] sm:$0xff]  ;;  %906 = vst.msk [vmem:[#allocation2 + $0x70] sm:$0xff] %vm313_vm0, %v873_v1  ;;  %922 = vst.msk [vmem:[#allocation2 + $0xf0] sm:$0xff] %vm313_vm0, %v889_v2  ;;  %v978_v17 = vmul.f32 %v1898_v13, %v939_v9  ;;  %v874_v19 = vadd.f32 %v1549_v11, %v361_v5 }
 0x12f   : > { %v994_v18 = vmul.f32 %v1898_v13, %v955_v10  ;;  %v890_v20 = vadd.f32 %v1597_v12, %v377_v7  ;;  %v1465_v21 = vpack.c.bf16 %v1048_v14, %v1048_v14 }
 0x130   : > { %v1064_v15 = vmax.f32 %v1032_v4, 0.0  ;;  %v1017_v23 = vadd.f32 %v1903_v16, %v978_v17  ;;  %907 = vst.msk [vmem:[#allocation2 + $0x78] sm:$0xff] %vm313_vm0, %v874_v19 }
 0x131   : > { %v1033_v24 = vadd.f32 %v1903_v16, %v994_v18  ;;  %v940_v25 = vld [vmem:[#allocation2 + $0x68] sm:$0xff]  ;;  %923 = vst.msk [vmem:[#allocation2 + $0xf8] sm:$0xff] %vm313_vm0, %v890_v20 }
 0x132   : > { %v1481_v22 = vpack.c.bf16 %v1064_v15, %v1064_v15  ;;  %v956_v26 = vld [vmem:[#allocation2 + $0xe8] sm:$0xff]  ;;  %1209 = vst.msk [vmem:[%s1919_s14 + $0x2c] sm:$0xf] %vm1197_vm1, %v1465_v21  ;;  %v1049_v27 = vmax.f32 %v1017_v23, 0.0  ;;  %v979_v29 = vmul.f32 %v1898_v13, %v940_v25 }
 0x133   : > { %v1065_v28 = vmax.f32 %v1033_v24, 0.0  ;;  %v995_v30 = vmul.f32 %v1898_v13, %v956_v26 }
 0x134   : > { %1225 = vst.msk [vmem:[%s1919_s14 + $0x6c] sm:$0xf] %vm1197_vm1, %v1481_v22  ;;  %v1466_v31 = vpack.c.bf16 %v1049_v27, %v1049_v27  ;;  %v1018_v33 = vadd.f32 %v1903_v16, %v979_v29 }
 0x135   : > { %v1482_v32 = vpack.c.bf16 %v1065_v28, %v1065_v28  ;;  %v1034_v34 = vadd.f32 %v1903_v16, %v995_v30  ;;  %v941_v35 = vld [vmem:[#allocation2 + $0x70] sm:$0xff] }
 0x136   : > { %v957_v36 = vld [vmem:[#allocation2 + $0xf0] sm:$0xff]  ;;  %v980_v37 = vmul.f32 %v1898_v13, %v941_v35  ;;  %1210 = vst.msk [vmem:[%s1919_s14 + $0x30] sm:$0xf] %vm1197_vm1, %v1466_v31  ;;  %v1050_v39 = vmax.f32 %v1018_v33, 0.0 }
 0x137   : > { %v996_v38 = vmul.f32 %v1898_v13, %v957_v36  ;;  %1226 = vst.msk [vmem:[%s1919_s14 + $0x70] sm:$0xf] %vm1197_vm1, %v1482_v32  ;;  %v1066_v40 = vmax.f32 %v1034_v34, 0.0  ;;  %v942_v45 = vld [vmem:[#allocation2 + $0x78] sm:$0xff] }
 0x138   : > { %v1019_v41 = vadd.f32 %v1903_v16, %v980_v37  ;;  %v1467_v43 = vpack.c.bf16 %v1050_v39, %v1050_v39  ;;  %v958_v46 = vld [vmem:[#allocation2 + $0xf8] sm:$0xff]  ;;  %v981_v49 = vmul.f32 %v1898_v13, %v942_v45 }
 0x139   : > { %v1035_v42 = vadd.f32 %v1903_v16, %v996_v38  ;;  %v1483_v44 = vpack.c.bf16 %v1066_v40, %v1066_v40  ;;  %v997_v50 = vmul.f32 %v1898_v13, %v958_v46 }
 0x13a   : > { %v1051_v47 = vmax.f32 %v1019_v41, 0.0  ;;  %1211 = vst.msk [vmem:[%s1919_s14 + $0x34] sm:$0xf] %vm1197_vm1, %v1467_v43  ;;  %v1020_v53 = vadd.f32 %v1903_v16, %v981_v49 }
 0x13b   : > { %v1067_v48 = vmax.f32 %v1035_v42, 0.0  ;;  %1227 = vst.msk [vmem:[%s1919_s14 + $0x74] sm:$0xf] %vm1197_vm1, %v1483_v44  ;;  %v1036_v54 = vadd.f32 %v1903_v16, %v997_v50 }
 0x13c   : > { %v1468_v51 = vpack.c.bf16 %v1051_v47, %v1051_v47  ;;  %v1052_v55 = vmax.f32 %v1020_v53, 0.0 }
 0x13d   : > { %v1484_v52 = vpack.c.bf16 %v1067_v48, %v1067_v48  ;;  %v1068_v56 = vmax.f32 %v1036_v54, 0.0 }
 0x13e   : > { %1212 = vst.msk [vmem:[%s1919_s14 + $0x38] sm:$0xf] %vm1197_vm1, %v1468_v51  ;;  %v1469_v57 = vpack.c.bf16 %v1052_v55, %v1052_v55 }
 0x13f   : > { %1228 = vst.msk [vmem:[%s1919_s14 + $0x78] sm:$0xf] %vm1197_vm1, %v1484_v52  ;;  %v1485_v58 = vpack.c.bf16 %v1068_v56, %v1068_v56 }
 0x140   : > { %1213 = vst.msk [vmem:[%s1919_s14 + $0x3c] sm:$0xf] %vm1197_vm1, %v1469_v57 }
 0x141   : > { %1229 = vst.msk [vmem:[%s1919_s14 + $0x7c] sm:$0xf] %vm1197_vm1, %v1485_v58 }
 0x142 PF: > { %s14_s17 = sadd.s32 1, %s1725_s17   ;;  %s2081_s15 = smov %s1721_s16 }
 0x143   : > { %p11_p5 = scmp.ge.s32.totalorder %s14_s17, 4   ;;  %s2082_s16 = smov %s2084_s18 }
 0x145   :  { %13 = sbr.rel (!%p11_p5) target bundleno = 2 (0x2), region = 83 }

</bundles_post_ra>
